<compile_context>
chip_gen: v7x
topology: tpu7x:2x2x1
jax: 0.10.0
libtpu: 0.0.40
codegen_flags: <defaults>
</compile_context>

<pallas_src>
import functools

import jax
import jax.numpy as jnp
from jax import lax
from jax.experimental import pallas as pl
from jax.experimental.pallas import tpu as pltpu


# ----------------------------------------------------------------------------
# Pallas kernel: multiRENL2.forward(t, ym, v, xim) for all N RENs at once.
# ----------------------------------------------------------------------------
def _multi_ren_kernel(iv_ref, mmat_ref, xi_ref, slab_ref, out_ref, *, n, n_xi, l):
    """Inputs (all VMEM resident, tiny):
         iv_ref   : (1, n+1)   merged [ym | v]
         mmat_ref : (N, n)     coupling matrix M
         xi_ref   : (N, n_xi)  padded per-REN states
         slab_ref : (N, R, C)  per-REN fused weights, R = n_xi+n+l, C = l+n_xi+p
                    rows = [xi | w | eps], cols = [recurrence pre-act | xi_new | u]
                    (1/Lambda and E^{-1} already folded in host-side)
       Output:
         out_ref  : (N, n_xi+p) = [xi_new | u]
    """
    f32 = jnp.float32
    iv = iv_ref[...]                                    # (1, n+1)
    ym_row = iv[:, :n]                                  # (1, n)
    v = iv[:, n:n + 1]                                  # (1, 1)

    # w_j = M[j,:] @ ym + e * v   (e one-hot at index 1), all RENs at once (VPU).
    utemp = jnp.sum(mmat_ref[...] * ym_row, axis=1, keepdims=True)            # (N, 1)
    e_row = (lax.broadcasted_iota(jnp.int32, (1, n), 1) == 1).astype(f32)     # (1, n)
    w_all = utemp + v * e_row                                                 # (N, n)

    xi_all = xi_ref[...]                                # (N, n_xi)
    W = slab_ref[...]                                   # (N, R, C)
    num_ren = xi_all.shape[0]
    K1 = n_xi + n
    C = W.shape[2]

    # Contraction of [xi | w] against EVERY column of the slab: unrolled
    # broadcast-FMAs on the VPU (exact f32; these shapes would waste the MXU).
    #   full[:, :l] = recurrence pre-activations (already 1/Lambda-scaled)
    #   full[:, l:] = xi/w contribution to [xi_new | u] (E^{-1} already folded)
    full = jnp.zeros((num_ren, C), f32)
    for k in range(n_xi):                              # independent FMAs
        full = full + xi_all[:, k:k + 1] * W[:, k, :]
    for k in range(n):
        full = full + w_all[:, k:k + 1] * W[:, n_xi + k, :]

    # Serial ReLU recurrence in column-update form.  D11 is strictly lower
    # triangular, so column i is final before step i reads it; each step adds
    # eps_i's contribution to later recurrence columns AND the output columns
    # in a single broadcast FMA (no masks, no cross-lane reduces).
    for i in range(l):
        eps_i = jnp.maximum(full[:, i:i + 1], 0.0)                            # (N, 1)
        full = full + eps_i * W[:, K1 + i, :]                                 # (N, C)

    out_ref[...] = full[:, l:]                          # (N, n_xi + p)


# ----------------------------------------------------------------------------
# Wrapper: fold constants, pack the per-REN weight slab, launch the kernel.
# ----------------------------------------------------------------------------
def _pad2(a, rows, cols):
    a = jnp.asarray(a, jnp.float32)
    return jnp.pad(a, ((0, rows - a.shape[0]), (0, cols - a.shape[1])))


def multi_ren_forward(t, ym, v, xim, Mmat, derived, n, p, n_xi_list, l_list):
    """Pallas port of multiRENL2.forward(t, ym, v, xim) -> (y, new_xi_list).

    Note: in the torch source `y[j] = u` stores into a numpy array (needs p == 1)
    and `xi[j] = ...` indexes an empty list; the evident intent (collect the new
    REN states) is implemented here.
    """
    del t  # unused, kept for signature parity with the PyTorch module
    N = Mmat.shape[0]
    assert n == N, "w_j = M[j,:]@ym + e*v broadcasts to length N, so n must equal N"
    assert N >= 2, "the torch code hardcodes the one-hot e at index 1, so N >= 2"
    n_xi_max = max(n_xi_list)
    l_max = max(l_list)
    hp = jax.lax.Precision.HIGHEST

    slabs, xis = [], []
    for j in range(N):
        d = derived[j]
        n_xi_j, l_j = n_xi_list[j], l_list[j]

        # Fold 1/Lambda into the recurrence weights (exact; Lambda > 0 by the
        # REN parameterization — asserted since everything is concrete here).
        lam = jnp.asarray(d["Lambda"], jnp.float32)
        assert bool(jnp.all(jnp.abs(lam) > 0.0)), "Lambda must be nonzero to fold 1/Lambda"
        inv_lam = (1.0 / lam)[:, None]
        C1s = jnp.asarray(d["C1"], jnp.float32) * inv_lam     # (l, n_xi)
        D11s = jnp.asarray(d["D11"], jnp.float32) * inv_lam   # (l, l) strictly lower
        D12s = jnp.asarray(d["D12"], jnp.float32) * inv_lam   # (l, n)

        # Fold E^{-1} into the state-update weights.
        E_inv = jnp.asarray(d["E_inv"], jnp.float32)
        EF = jnp.matmul(E_inv, jnp.asarray(d["F"], jnp.float32), precision=hp)
        EB1 = jnp.matmul(E_inv, jnp.asarray(d["B1"], jnp.float32), precision=hp)
        EB2 = jnp.matmul(E_inv, jnp.asarray(d["B2"], jnp.float32), precision=hp)

        # Slab: rows = [xi | w | eps], cols = [recurrence (l) | xi_new (n_xi) | u (p)].
        row_xi = jnp.concatenate(
            [_pad2(C1s.T, n_xi_max, l_max),
             _pad2(EF.T, n_xi_max, n_xi_max),
             _pad2(jnp.asarray(d["C2"], jnp.float32).T, n_xi_max, p)], axis=1)
        row_w = jnp.concatenate(
            [_pad2(D12s.T, n, l_max),
             _pad2(EB2.T, n, n_xi_max),
             _pad2(jnp.asarray(d["D22"], jnp.float32).T, n, p)], axis=1)
        row_eps = jnp.concatenate(
            [_pad2(D11s.T, l_max, l_max),
             _pad2(EB1.T, l_max, n_xi_max),
             _pad2(jnp.asarray(d["D21"], jnp.float32).T, l_max, p)], axis=1)
        slabs.append(jnp.concatenate([row_xi, row_w, row_eps], axis=0))

        xis.append(jnp.pad(jnp.asarray(xim[j], jnp.float32), (0, n_xi_max - n_xi_j)))

    slab = jnp.stack(slabs)      # (N, n_xi+n+l, l+n_xi+p) — single weight-slab DMA
    xi0 = jnp.stack(xis)         # (N, n_xi)
    mmat = jnp.asarray(Mmat, jnp.float32)
    iv = jnp.concatenate([jnp.asarray(ym, jnp.float32).reshape(1, -1),
                          jnp.asarray(v, jnp.float32).reshape(1, 1)], axis=1)   # (1, n+1)

    kernel = functools.partial(_multi_ren_kernel, n=n, n_xi=n_xi_max, l=l_max)
    vmem = pl.BlockSpec(memory_space=pltpu.MemorySpace.VMEM)

    # Grid-less call: 4 input DMAs + 1 dense output store (was 9 + 2).
    # (v7x note: at N=4 a parallel grid over REN groups is pure overhead; add one
    #  only if the bank / time loop grows. VMEM footprint here is a few KB.)
    out = pl.pallas_call(
        kernel,
        out_shape=jax.ShapeDtypeStruct((N, n_xi_max + p), jnp.float32),
        in_specs=[vmem] * 4,
        out_specs=vmem,
    )(iv, mmat, xi0, slab)

    y = out[:, n_xi_max]                              # y[j] = u_j (p == 1)
    xi_new = [out[j, :n_xi_list[j]] for j in range(N)]
    return y, xi_new


# ----------------------------------------------------------------------------
# Host-side parameter construction (JAX port of the set_model_param methods).
# ----------------------------------------------------------------------------
def _ren_set_model_param(gamma, raw, n, m, n_xi, l, epsilon=1e-3):
    """RENRG.set_model_param for one REN (init-time, plain JAX)."""
    s = max(n, m)
    X, Y, B2, C2, D21 = raw["X"], raw["Y"], raw["B2"], raw["C2"], raw["D21"]
    X3, Y3, D12 = raw["X3"], raw["Y3"], raw["D12"]
    eye = lambda k: jnp.eye(k, dtype=jnp.float32)

    R = gamma * eye(n)
    Q = (-1.0 / gamma) * eye(m)
    Mw = X3 @ X3.T + Y3 - Y3.T + epsilon * eye(s)
    M_tilde = (eye(s) - Mw) @ jnp.linalg.inv(eye(s) + Mw)
    Zeta = M_tilde[0:m, 0:n]
    D22 = gamma * Zeta
    R_cap = R - (1.0 / gamma) * (D22.T @ D22)
    C2_cap = D22.T @ Q @ C2
    D21_cap = D22.T @ Q @ D21 - D12.T
    vec_R = jnp.concatenate([C2_cap.T, D21_cap.T, B2], axis=0)
    vec_Q = jnp.concatenate([C2.T, D21.T, jnp.zeros((n_xi, m), jnp.float32)], axis=0)
    H = (X.T @ X + epsilon * eye(2 * n_xi + l)
         + vec_R @ jnp.linalg.inv(R_cap) @ vec_R.T
         - vec_Q @ Q @ vec_Q.T)
    h1, h2, h3 = H[:n_xi], H[n_xi:n_xi + l], H[n_xi + l:]
    H11 = h1[:, :n_xi]
    H21, H22 = h2[:, :n_xi], h2[:, n_xi:n_xi + l]
    H31, H32, H33 = h3[:, :n_xi], h3[:, n_xi:n_xi + l], h3[:, n_xi + l:]
    E = 0.5 * (H11 + H33 + Y - Y.T)
    return dict(F=H31, B1=H32, B2=B2, E_inv=jnp.linalg.inv(E),
                Lambda=jnp.diag(H22), D11=-jnp.tril(H22, k=-1), C1=-H21,
                C2=C2, D21=D21, D12=D12, D22=D22)


def multi_ren_set_model_param(params, n, p, n_xi_list, l_list):
    """multiRENL2.set_model_param: derive gamma_j, then each REN's matrices."""
    Mmat = params["M"]
    pr2, y2 = jnp.exp(params["pr"]), jnp.exp(params["y"])
    PR = jnp.diag(pr2)
    A = Mmat.T @ PR @ Mmat
    P = jnp.diag(jnp.trace(A) + y2)
    Rg = jnp.linalg.inv(P) @ PR
    gamma = jnp.sqrt(jnp.diagonal(Rg))
    return [_ren_set_model_param(gamma[j], params["rens"][j], n, p,
                                 n_xi_list[j], l_list[j])
            for j in range(len(params["rens"]))]


def init_multi_ren_params(key, N, n, p, n_xi_list, l_list):
    """Deterministic raw parameters mimicking torch.randn init (std = 1)."""
    key, kpr, ky, km = jax.random.split(key, 4)
    params = dict(pr=jax.random.normal(kpr, (N,), jnp.float32),
                  y=jax.random.normal(ky, (N,), jnp.float32),
                  M=jax.random.normal(km, (N, N), jnp.float32),
                  rens=[])
    for j in range(N):
        n_xi, l = n_xi_list[j], l_list[j]
        s = max(n, p)
        key, k1, k2, k3, k4, k5, k6, k7, k8 = jax.random.split(key, 9)
        params["rens"].append(dict(
            X=jax.random.normal(k1, (2 * n_xi + l, 2 * n_xi + l), jnp.float32),
            Y=jax.random.normal(k2, (n_xi, n_xi), jnp.float32),
            B2=jax.random.normal(k3, (n_xi, n), jnp.float32),
            C2=jax.random.normal(k4, (p, n_xi), jnp.float32),
            D21=jax.random.normal(k5, (p, l), jnp.float32),
            X3=jax.random.normal(k6, (s, s), jnp.float32),
            Y3=jax.random.normal(k7, (s, s), jnp.float32),
            D12=jax.random.normal(k8, (l, n), jnp.float32),
        ))
    return params


# ----------------------------------------------------------------------------
# Pure-JAX reference (mirrors the PyTorch forward) for correctness checking.
# ----------------------------------------------------------------------------
def multi_ren_reference(t, ym, v, xim, Mmat, derived):
    del t
    N = Mmat.shape[0]
    with jax.default_matmul_precision("highest"):
        e = jnp.zeros((N,), jnp.float32).at[1].set(1.0)   # the torch code hardcodes e[1] = 1
        ys, xis = [], []
        for j in range(N):
            d = derived[j]
            w = jnp.dot(Mmat[j, :], ym) + e * v
            xi = xim[j]
            l_j = d["Lambda"].shape[0]
            eps = jnp.zeros((l_j,), jnp.float32)
            for i in range(l_j):
                vi = (jnp.dot(d["C1"][i, :], xi) + jnp.dot(d["D11"][i, :], eps)
                      + jnp.dot(d["D12"][i, :], w))
                eps = eps.at[i].set(jnp.maximum(vi / d["Lambda"][i], 0.0))
            e_xi = d["F"] @ xi + d["B1"] @ eps + d["B2"] @ w
            xi_new = d["E_inv"] @ e_xi
            u = d["C2"] @ xi + d["D21"] @ eps + d["D22"] @ w
            ys.append(u[0])
            xis.append(xi_new)
        return jnp.stack(ys), xis


if __name__ == "__main__":
    # Small shapes implied by the module's forward:
    #   w_j = M[j,:]@ym + e*v broadcasts to length N -> REN input dim n must equal N,
    #   y[j] = u (scalar numpy store)                -> REN output dim p must be 1.
    N = 4
    n = N
    p = 1
    n_xi = [8, 8, 8, 8]
    l = [4, 4, 4, 4]

    key = jax.random.PRNGKey(0)
    key, kp = jax.random.split(key)
    params = init_multi_ren_params(kp, N, n, p, n_xi, l)
    derived = multi_ren_set_model_param(params, n, p, n_xi, l)

    key, kym, kv, kxi = jax.random.split(key, 4)
    ym = jax.random.normal(kym, (N,), jnp.float32)
    v = jax.random.normal(kv, (), jnp.float32)
    xim = [jax.random.normal(jax.random.fold_in(kxi, j), (n_xi[j],), jnp.float32)
           for j in range(N)]

    y, xi_new = multi_ren_forward(0.0, ym, v, xim, params["M"], derived,
                                  n, p, n_xi, l)
    y = jax.block_until_ready(y)
    xi_new = [jax.block_until_ready(x) for x in xi_new]

    y_ref, xi_ref = multi_ren_reference(0.0, ym, v, xim, params["M"], derived)
    assert y.shape == y_ref.shape, (y.shape, y_ref.shape)
    # The kernel does every contraction in exact f32 on the VPU (no MXU passes);
    # the only remaining differences vs the reference are host-side folding
    # reassociations (E^{-1}@F etc., 1/Lambda scaling), so the tolerance is 10x
    # tighter than the previous MXU-based version.
    assert jnp.allclose(y, y_ref, atol=2e-3, rtol=2e-3), "y mismatch vs reference"
    for j in range(N):
        assert xi_new[j].shape == xi_ref[j].shape
        assert jnp.allclose(xi_new[j], xi_ref[j], atol=2e-3, rtol=2e-3), \
            f"xi[{j}] mismatch vs reference"

    print("KERNEL_OK")
</pallas_src>

<mosaic_0001>
module attributes {stable_mosaic.version = 11 : i64} {
  func.func @_multi_ren_kernel(%arg0: memref<1x5xf32, #tpu.memory_space<vmem>>, %arg1: memref<4x4xf32, #tpu.memory_space<vmem>>, %arg2: memref<4x8xf32, #tpu.memory_space<vmem>>, %arg3: memref<4x16x13xf32, #tpu.memory_space<vmem>>, %arg4: memref<4x9xf32, #tpu.memory_space<vmem>>) attributes {dimension_semantics = [], scalar_prefetch = 0 : i64, scratch_operands = 0 : i64, tpu.core_type = #tpu.core_type<tc>} {
    %c0 = arith.constant 0 : index
    %c0_0 = arith.constant 0 : index
    %0 = vector.load %arg0[%c0, %c0_0] : memref<1x5xf32, #tpu.memory_space<vmem>>, vector<1x5xf32>
    %1 = vector.extract_strided_slice %0 {offsets = [0, 0], sizes = [1, 4], strides = [1, 1]} : vector<1x5xf32> to vector<1x4xf32>
    %2 = vector.extract_strided_slice %0 {offsets = [0, 4], sizes = [1, 1], strides = [1, 1]} : vector<1x5xf32> to vector<1x1xf32>
    %c0_1 = arith.constant 0 : index
    %c0_2 = arith.constant 0 : index
    %3 = vector.load %arg1[%c0_1, %c0_2] : memref<4x4xf32, #tpu.memory_space<vmem>>, vector<4x4xf32>
    %4 = vector.broadcast %1 : vector<1x4xf32> to vector<4x4xf32>
    %5 = arith.mulf %3, %4 : vector<4x4xf32>
    %cst = arith.constant dense<0.000000e+00> : vector<4xf32>
    %6 = vector.multi_reduction <add>, %5, %cst [1] : vector<4x4xf32> to vector<4xf32>
    %7 = vector.shape_cast %6 : vector<4xf32> to vector<4x1xf32>
    %8 = tpu.iota {dimensions = array<i32: 1>} : vector<1x4xi32>
    %c1_i32 = arith.constant 1 : i32
    %9 = vector.broadcast %c1_i32 : i32 to vector<1x4xi32>
    %10 = arith.cmpi eq, %8, %9 : vector<1x4xi32>
    %11 = arith.extui %10 : vector<1x4xi1> to vector<1x4xi32>
    %12 = arith.sitofp %11 : vector<1x4xi32> to vector<1x4xf32>
    %13 = vector.broadcast %2 : vector<1x1xf32> to vector<1x4xf32>
    %14 = arith.mulf %13, %12 : vector<1x4xf32>
    %15 = vector.broadcast %7 : vector<4x1xf32> to vector<4x4xf32>
    %16 = vector.broadcast %14 : vector<1x4xf32> to vector<4x4xf32>
    %17 = arith.addf %15, %16 : vector<4x4xf32>
    %c0_3 = arith.constant 0 : index
    %c0_4 = arith.constant 0 : index
    %18 = vector.load %arg2[%c0_3, %c0_4] : memref<4x8xf32, #tpu.memory_space<vmem>>, vector<4x8xf32>
    %c0_5 = arith.constant 0 : index
    %c0_6 = arith.constant 0 : index
    %c0_7 = arith.constant 0 : index
    %19 = vector.load %arg3[%c0_5, %c0_6, %c0_7] : memref<4x16x13xf32, #tpu.memory_space<vmem>>, vector<4x16x13xf32>
    %cst_8 = arith.constant 0.000000e+00 : f32
    %20 = vector.broadcast %cst_8 : f32 to vector<4x13xf32>
    %21 = vector.extract_strided_slice %18 {offsets = [0, 0], sizes = [4, 1], strides = [1, 1]} : vector<4x8xf32> to vector<4x1xf32>
    %22 = vector.extract_strided_slice %19 {offsets = [0, 0, 0], sizes = [4, 1, 13], strides = [1, 1, 1]} : vector<4x16x13xf32> to vector<4x1x13xf32>
    %23 = vector.shape_cast %22 : vector<4x1x13xf32> to vector<4x13xf32>
    %24 = vector.broadcast %21 : vector<4x1xf32> to vector<4x13xf32>
    %25 = arith.mulf %24, %23 : vector<4x13xf32>
    %26 = arith.addf %20, %25 : vector<4x13xf32>
    %27 = vector.extract_strided_slice %18 {offsets = [0, 1], sizes = [4, 1], strides = [1, 1]} : vector<4x8xf32> to vector<4x1xf32>
    %28 = vector.extract_strided_slice %19 {offsets = [0, 1, 0], sizes = [4, 1, 13], strides = [1, 1, 1]} : vector<4x16x13xf32> to vector<4x1x13xf32>
    %29 = vector.shape_cast %28 : vector<4x1x13xf32> to vector<4x13xf32>
    %30 = vector.broadcast %27 : vector<4x1xf32> to vector<4x13xf32>
    %31 = arith.mulf %30, %29 : vector<4x13xf32>
    %32 = arith.addf %26, %31 : vector<4x13xf32>
    %33 = vector.extract_strided_slice %18 {offsets = [0, 2], sizes = [4, 1], strides = [1, 1]} : vector<4x8xf32> to vector<4x1xf32>
    %34 = vector.extract_strided_slice %19 {offsets = [0, 2, 0], sizes = [4, 1, 13], strides = [1, 1, 1]} : vector<4x16x13xf32> to vector<4x1x13xf32>
    %35 = vector.shape_cast %34 : vector<4x1x13xf32> to vector<4x13xf32>
    %36 = vector.broadcast %33 : vector<4x1xf32> to vector<4x13xf32>
    %37 = arith.mulf %36, %35 : vector<4x13xf32>
    %38 = arith.addf %32, %37 : vector<4x13xf32>
    %39 = vector.extract_strided_slice %18 {offsets = [0, 3], sizes = [4, 1], strides = [1, 1]} : vector<4x8xf32> to vector<4x1xf32>
    %40 = vector.extract_strided_slice %19 {offsets = [0, 3, 0], sizes = [4, 1, 13], strides = [1, 1, 1]} : vector<4x16x13xf32> to vector<4x1x13xf32>
    %41 = vector.shape_cast %40 : vector<4x1x13xf32> to vector<4x13xf32>
    %42 = vector.broadcast %39 : vector<4x1xf32> to vector<4x13xf32>
    %43 = arith.mulf %42, %41 : vector<4x13xf32>
    %44 = arith.addf %38, %43 : vector<4x13xf32>
    %45 = vector.extract_strided_slice %18 {offsets = [0, 4], sizes = [4, 1], strides = [1, 1]} : vector<4x8xf32> to vector<4x1xf32>
    %46 = vector.extract_strided_slice %19 {offsets = [0, 4, 0], sizes = [4, 1, 13], strides = [1, 1, 1]} : vector<4x16x13xf32> to vector<4x1x13xf32>
    %47 = vector.shape_cast %46 : vector<4x1x13xf32> to vector<4x13xf32>
    %48 = vector.broadcast %45 : vector<4x1xf32> to vector<4x13xf32>
    %49 = arith.mulf %48, %47 : vector<4x13xf32>
    %50 = arith.addf %44, %49 : vector<4x13xf32>
    %51 = vector.extract_strided_slice %18 {offsets = [0, 5], sizes = [4, 1], strides = [1, 1]} : vector<4x8xf32> to vector<4x1xf32>
    %52 = vector.extract_strided_slice %19 {offsets = [0, 5, 0], sizes = [4, 1, 13], strides = [1, 1, 1]} : vector<4x16x13xf32> to vector<4x1x13xf32>
    %53 = vector.shape_cast %52 : vector<4x1x13xf32> to vector<4x13xf32>
    %54 = vector.broadcast %51 : vector<4x1xf32> to vector<4x13xf32>
    %55 = arith.mulf %54, %53 : vector<4x13xf32>
    %56 = arith.addf %50, %55 : vector<4x13xf32>
    %57 = vector.extract_strided_slice %18 {offsets = [0, 6], sizes = [4, 1], strides = [1, 1]} : vector<4x8xf32> to vector<4x1xf32>
    %58 = vector.extract_strided_slice %19 {offsets = [0, 6, 0], sizes = [4, 1, 13], strides = [1, 1, 1]} : vector<4x16x13xf32> to vector<4x1x13xf32>
    %59 = vector.shape_cast %58 : vector<4x1x13xf32> to vector<4x13xf32>
    %60 = vector.broadcast %57 : vector<4x1xf32> to vector<4x13xf32>
    %61 = arith.mulf %60, %59 : vector<4x13xf32>
    %62 = arith.addf %56, %61 : vector<4x13xf32>
    %63 = vector.extract_strided_slice %18 {offsets = [0, 7], sizes = [4, 1], strides = [1, 1]} : vector<4x8xf32> to vector<4x1xf32>
    %64 = vector.extract_strided_slice %19 {offsets = [0, 7, 0], sizes = [4, 1, 13], strides = [1, 1, 1]} : vector<4x16x13xf32> to vector<4x1x13xf32>
    %65 = vector.shape_cast %64 : vector<4x1x13xf32> to vector<4x13xf32>
    %66 = vector.broadcast %63 : vector<4x1xf32> to vector<4x13xf32>
    %67 = arith.mulf %66, %65 : vector<4x13xf32>
    %68 = arith.addf %62, %67 : vector<4x13xf32>
    %69 = vector.extract_strided_slice %17 {offsets = [0, 0], sizes = [4, 1], strides = [1, 1]} : vector<4x4xf32> to vector<4x1xf32>
    %70 = vector.extract_strided_slice %19 {offsets = [0, 8, 0], sizes = [4, 1, 13], strides = [1, 1, 1]} : vector<4x16x13xf32> to vector<4x1x13xf32>
    %71 = vector.shape_cast %70 : vector<4x1x13xf32> to vector<4x13xf32>
    %72 = vector.broadcast %69 : vector<4x1xf32> to vector<4x13xf32>
    %73 = arith.mulf %72, %71 : vector<4x13xf32>
    %74 = arith.addf %68, %73 : vector<4x13xf32>
    %75 = vector.extract_strided_slice %17 {offsets = [0, 1], sizes = [4, 1], strides = [1, 1]} : vector<4x4xf32> to vector<4x1xf32>
    %76 = vector.extract_strided_slice %19 {offsets = [0, 9, 0], sizes = [4, 1, 13], strides = [1, 1, 1]} : vector<4x16x13xf32> to vector<4x1x13xf32>
    %77 = vector.shape_cast %76 : vector<4x1x13xf32> to vector<4x13xf32>
    %78 = vector.broadcast %75 : vector<4x1xf32> to vector<4x13xf32>
    %79 = arith.mulf %78, %77 : vector<4x13xf32>
    %80 = arith.addf %74, %79 : vector<4x13xf32>
    %81 = vector.extract_strided_slice %17 {offsets = [0, 2], sizes = [4, 1], strides = [1, 1]} : vector<4x4xf32> to vector<4x1xf32>
    %82 = vector.extract_strided_slice %19 {offsets = [0, 10, 0], sizes = [4, 1, 13], strides = [1, 1, 1]} : vector<4x16x13xf32> to vector<4x1x13xf32>
    %83 = vector.shape_cast %82 : vector<4x1x13xf32> to vector<4x13xf32>
    %84 = vector.broadcast %81 : vector<4x1xf32> to vector<4x13xf32>
    %85 = arith.mulf %84, %83 : vector<4x13xf32>
    %86 = arith.addf %80, %85 : vector<4x13xf32>
    %87 = vector.extract_strided_slice %17 {offsets = [0, 3], sizes = [4, 1], strides = [1, 1]} : vector<4x4xf32> to vector<4x1xf32>
    %88 = vector.extract_strided_slice %19 {offsets = [0, 11, 0], sizes = [4, 1, 13], strides = [1, 1, 1]} : vector<4x16x13xf32> to vector<4x1x13xf32>
    %89 = vector.shape_cast %88 : vector<4x1x13xf32> to vector<4x13xf32>
    %90 = vector.broadcast %87 : vector<4x1xf32> to vector<4x13xf32>
    %91 = arith.mulf %90, %89 : vector<4x13xf32>
    %92 = arith.addf %86, %91 : vector<4x13xf32>
    %93 = vector.extract_strided_slice %92 {offsets = [0, 0], sizes = [4, 1], strides = [1, 1]} : vector<4x13xf32> to vector<4x1xf32>
    %cst_9 = arith.constant 0.000000e+00 : f32
    %94 = vector.broadcast %cst_9 : f32 to vector<4x1xf32>
    %95 = arith.maximumf %93, %94 : vector<4x1xf32>
    %96 = vector.extract_strided_slice %19 {offsets = [0, 12, 0], sizes = [4, 1, 13], strides = [1, 1, 1]} : vector<4x16x13xf32> to vector<4x1x13xf32>
    %97 = vector.shape_cast %96 : vector<4x1x13xf32> to vector<4x13xf32>
    %98 = vector.broadcast %95 : vector<4x1xf32> to vector<4x13xf32>
    %99 = arith.mulf %98, %97 : vector<4x13xf32>
    %100 = arith.addf %92, %99 : vector<4x13xf32>
    %101 = vector.extract_strided_slice %100 {offsets = [0, 1], sizes = [4, 1], strides = [1, 1]} : vector<4x13xf32> to vector<4x1xf32>
    %cst_10 = arith.constant 0.000000e+00 : f32
    %102 = vector.broadcast %cst_10 : f32 to vector<4x1xf32>
    %103 = arith.maximumf %101, %102 : vector<4x1xf32>
    %104 = vector.extract_strided_slice %19 {offsets = [0, 13, 0], sizes = [4, 1, 13], strides = [1, 1, 1]} : vector<4x16x13xf32> to vector<4x1x13xf32>
    %105 = vector.shape_cast %104 : vector<4x1x13xf32> to vector<4x13xf32>
    %106 = vector.broadcast %103 : vector<4x1xf32> to vector<4x13xf32>
    %107 = arith.mulf %106, %105 : vector<4x13xf32>
    %108 = arith.addf %100, %107 : vector<4x13xf32>
    %109 = vector.extract_strided_slice %108 {offsets = [0, 2], sizes = [4, 1], strides = [1, 1]} : vector<4x13xf32> to vector<4x1xf32>
    %cst_11 = arith.constant 0.000000e+00 : f32
    %110 = vector.broadcast %cst_11 : f32 to vector<4x1xf32>
    %111 = arith.maximumf %109, %110 : vector<4x1xf32>
    %112 = vector.extract_strided_slice %19 {offsets = [0, 14, 0], sizes = [4, 1, 13], strides = [1, 1, 1]} : vector<4x16x13xf32> to vector<4x1x13xf32>
    %113 = vector.shape_cast %112 : vector<4x1x13xf32> to vector<4x13xf32>
    %114 = vector.broadcast %111 : vector<4x1xf32> to vector<4x13xf32>
    %115 = arith.mulf %114, %113 : vector<4x13xf32>
    %116 = arith.addf %108, %115 : vector<4x13xf32>
    %117 = vector.extract_strided_slice %116 {offsets = [0, 3], sizes = [4, 1], strides = [1, 1]} : vector<4x13xf32> to vector<4x1xf32>
    %cst_12 = arith.constant 0.000000e+00 : f32
    %118 = vector.broadcast %cst_12 : f32 to vector<4x1xf32>
    %119 = arith.maximumf %117, %118 : vector<4x1xf32>
    %120 = vector.extract_strided_slice %19 {offsets = [0, 15, 0], sizes = [4, 1, 13], strides = [1, 1, 1]} : vector<4x16x13xf32> to vector<4x1x13xf32>
    %121 = vector.shape_cast %120 : vector<4x1x13xf32> to vector<4x13xf32>
    %122 = vector.broadcast %119 : vector<4x1xf32> to vector<4x13xf32>
    %123 = arith.mulf %122, %121 : vector<4x13xf32>
    %124 = arith.addf %116, %123 : vector<4x13xf32>
    %125 = vector.extract_strided_slice %124 {offsets = [0, 4], sizes = [4, 9], strides = [1, 1]} : vector<4x13xf32> to vector<4x9xf32>
    %c0_13 = arith.constant 0 : index
    %c0_14 = arith.constant 0 : index
    %126 = vector.load %arg4[%c0_13, %c0_14] : memref<4x9xf32, #tpu.memory_space<vmem>>, vector<4x9xf32>
    tpu.vector_store %arg4[%c0_13, %c0_14], %125 {strides = array<i32>} : memref<4x9xf32, #tpu.memory_space<vmem>>, vector<4x9xf32>,
    return
  }
}

</mosaic_0001>

<bundles_post_ra>
// kernel: tpu_custom_call.1
= control target key start
LH: loop header
LB: loop body
LE: loop exit
PB: predicated region body
PF: predicated region fallthrough
CT: control target
= control target key end

     0   :  { %v21_v0 = vlaneseq  ;;  %v365_v1 = vmov 4   ;;  %v366_v4 = vmov 0   ;;  %s580_s0 = inlined_call_operand.vmem [shape: f32[1,5], index: 0, kind: input, shape index: {}]   ;;  %s581_s1 = inlined_call_operand.vmem [shape: f32[4,4], index: 1, kind: input, shape index: {}]   ;;  %s582_s2 = inlined_call_operand.vmem [shape: f32[4,8], index: 2, kind: input, shape index: {}]   ;;  %s583_s3 = inlined_call_operand.vmem [shape: f32[4,16,13], index: 3, kind: input, shape index: {}]   ;;  %s584_s4 = inlined_call_operand.hbm [shape: f32[4,9], index: 4, kind: output, shape index: {}]  }
   0x1   :  { %324 = vset.pattern.permute.xlu0 %v365_v1  ;;  %v46_v2 = vld [vmem:[%s582_s2] sm:$0xf]  ;;  %325 = vset.pattern.permute.xlu1 %v366_v4 }
   0x2   :  { %v22_v3 = vshrl.u32 %v21_v0, 7 }
   0x3   :  { %9 = vsyncpa [#allocation3], 0  ;;  %v18_v5 = vld [vmem:[%s580_s0] sm:$0x1]  ;;  %57 = vperm.xlu1 %325, %v46_v2   ;;  %vm27_vm0 = vcmask 27648   ;;  %v367_v9 = vmov 1  }
   0x4   :  { %v23_v6 = vsub.s32 0, %v22_v3  ;;  %v19_v7 = vld [vmem:[%s581_s1] sm:$0xf]  ;;  %v368_v12 = vmov 2   ;;  %v369_v13 = vmov 3   ;;  %v370_v14 = vmov 5  }
   0x5   :  { %v371_v15 = vmov 6   ;;  %v372_v16 = vmov 7   ;;  %v32_v17 = vand.u32 127, %v21_v0  ;;  %v373_v19 = vmov 0.0   ;;  %v417_v27 = vld [vmem:[%s583_s3] sm:$0xff]  ;;  %v422_v28 = vld [vmem:[%s583_s3 + $0x10] sm:$0xff] }
   0x6   :  { %v24_v8 = vrot.slane %v18_v5, %v23_v6  ;;  %v427_v30 = vld [vmem:[%s583_s3 + $0x20] sm:$0xff]  ;;  %v64_v31 = vrot.slane %v422_v28, 7  ;;  %v80_v32 = vrot.slane %v417_v27, 1  ;;  %vm65_vm2 = vcmask 1041409   ;;  %v434_v33 = vld [vmem:[%s583_s3 + $0x30] sm:$0xff]  ;;  %s375_s8 = smov [#allocation2]  }
   0x7   :  { %326 = vset.pattern.permute.xlu1 %v367_v9  ;;  %vm33_vm1 = vcmp.eq.s32.totalorder %v32_v17, 1  ;;  %v67_v34 = vrot.slane %v427_v30, 6  ;;  %vm68_vm3 = vcmask 1042434   ;;  %v82_v35 = vrot.slane %v427_v30, 7  ;;  %s304_s9 = sshll.u32 %s375_s8, 4  ;;  %s305_s9 = int_to_ptr.vmem [resolvable:$true] %s304_s9 }
   0x8   :  { %v26_v10 = vmul.f32 %v24_v8, %v19_v7  ;;  %77 = vperm.xlu1 %326, %v46_v2   ;;  %v312_v20 = vsel %vm33_vm1, 1.0, %v373_v19  ;;  %v66_v37 = vsel %vm65_vm2, %v64_v31, %v417_v27  ;;  %v81_v38 = vsel %vm65_vm2, %v422_v28, %v80_v32  ;;  %s341_s10 = scalar_lea.vmem %s305_s9, 64  ;;  %p346_p1 = scmp.lt.s32.totalorder %s305_s9, %s305_s9 }
   0x9   :  { %v93_v39 = vrot.slane %v417_v27, 2  ;;  %v94_v40 = vrot.slane %v422_v28, 1  ;;  %v70_v41 = vrot.slane %v434_v33, 5  ;;  %v84_v42 = vrot.slane %v434_v33, 6  ;;  %p342_p0 = scmp.ne.s32.totalorder %s305_s9, %s341_s10  ;;  %p347_p2 = scmp.lt.s32.totalorder %s341_s10, %s341_s10 }
   0xa   :  { %v28_v11 = vsel %vm27_vm0, %v26_v10, 0.0  ;;  %v69_v43 = vsel %vm68_vm3, %v67_v34, %v66_v37  ;;  %vm71_vm4 = vcmask 1043459   ;;  %v83_v44 = vsel %vm68_vm3, %v82_v35, %v81_v38 }
   0xb   :  { %29 = vadd.xlane.f32.xlu0 %v28_v11  ;;  %v95_v45 = vsel %vm65_vm2, %v94_v40, %v93_v39  ;;  %v106_v46 = vrot.slane %v417_v27, 3  ;;  %v107_v47 = vrot.slane %v422_v28, 2  ;;  %v72_v49 = vsel %vm71_vm4, %v70_v41, %v69_v43  ;;  %v508_v41 = vld [vmem:[%s583_s3 + $0x38] sm:$0xff]  ;;  %p348_p3 = por %p347_p2, %p346_p1 }
   0xc   :  { %327 = vset.pattern.permute.xlu1 %v368_v12  ;;  %v85_v50 = vsel %vm71_vm4, %v84_v42, %v83_v44  ;;  %v97_v51 = vrot.slane %v434_v33, 7  ;;  %v96_v52 = vsel %vm68_vm3, %v427_v30, %v95_v45  ;;  %v109_v53 = vrot.slane %v427_v30, 1 }
   0xd   :  { %90 = vperm.xlu1 %327, %v46_v2   ;;  %v108_v54 = vsel %vm65_vm2, %v107_v47, %v106_v46  ;;  %v119_v55 = vrot.slane %v417_v27, 4  ;;  %v120_v56 = vrot.slane %v422_v28, 3  ;;  %v122_v61 = vrot.slane %v427_v30, 2  ;;  %p349_p4 = pnand %p348_p3, %p342_p0 }
   0xe   :  { %v98_v59 = vsel %vm71_vm4, %v97_v51, %v96_v52  ;;  %v110_v60 = vsel %vm68_vm3, %v109_v53, %v108_v54  ;;  %v133_v0 = vrot.slane %v417_v27, 5  ;;  %v136_v7 = vrot.slane %v427_v30, 3 }
   0xf   :  { %v121_v63 = vsel %vm65_vm2, %v120_v56, %v119_v55  ;;  %v147_v8 = vrot.slane %v417_v27, 6  ;;  %v138_v17 = vrot.slane %v434_v33, 2  ;;  %v164_v32 = vrot.slane %v427_v30, 5 }
  0x10   :  { %v166_v37 = vrot.slane %v434_v33, 4  ;;  %v197_v54 = vrot.slane %v508_v41, 6  ;;  %vm296_vm5 = vcmask 68608  }
  0x11   :  { %328 = vset.pattern.permute.xlu1 %v369_v13 }
  0x12   :  { %103 = vperm.xlu1 %328, %v46_v2  }
  0x16   :  { %329 = vset.pattern.permute.xlu1 %v365_v1  ;;  %v134_v1 = vrot.slane %v422_v28, 4 }
  0x17   :  { %116 = vperm.xlu1 %329, %v46_v2  }
  0x18   :  { %v135_v10 = vsel %vm65_vm2, %v134_v1, %v133_v0 }
  0x19   :  { %v137_v19 = vsel %vm68_vm3, %v136_v7, %v135_v10 }
  0x1b   :  { %330 = vset.pattern.permute.xlu1 %v370_v14 }
  0x1c   :  { %130 = vperm.xlu1 %330, %v46_v2  }
  0x20   :  { %331 = vset.pattern.permute.xlu1 %v371_v15 }
  0x21   :  { %37 = vperm.xlu0 %324, %v18_v5   ;;  %144 = vperm.xlu1 %331, %v46_v2   ;;  %v124_v5 = vrot.slane %v434_v33, 1 }
  0x25   :  { %332 = vset.pattern.permute.xlu1 %v372_v16  ;;  %337 = vset.pattern.permute.xlu0 %v366_v4 }
  0x26   :  { %158 = vperm.xlu1 %332, %v46_v2  }
  0x2a   :  { %333 = vset.pattern.permute.xlu1 %v366_v4  ;;  %v111_v4 = vsel %vm71_vm4, %v434_v33, %v110_v60 }
  0x82   :  { %v58_v25 = vpop.permute.xlu1 %57 }
  0x83   :  { %v74_v57 = vmul.f32 %v72_v49, %v58_v25 }
  0x87   :  { %v78_v26 = vpop.permute.xlu1 %77 }
  0x88   :  { %v87_v58 = vmul.f32 %v85_v50, %v78_v26  ;;  %v152_v26 = vrot.slane %v434_v33, 3 }
  0x8a   :  { %v88_v2 = vadd.f32 %v87_v58, %v74_v57 }
  0x8c   :  { %v91_v29 = vpop.permute.xlu1 %90 }
  0x8d   :  { %v100_v3 = vmul.f32 %v98_v59, %v91_v29  ;;  %v139_v29 = vsel %vm71_vm4, %v138_v17, %v137_v19 }
  0x8f   :  { %v101_v11 = vadd.f32 %v100_v3, %v88_v2 }
  0x91   :  { %v104_v36 = vpop.permute.xlu1 %103 }
  0x92   :  { %v113_v14 = vmul.f32 %v111_v4, %v104_v36  ;;  %v500_v36 = vld [vmem:[%s583_s3 + $0x8] sm:$0xff] }
  0x93   :  { %v193_v38 = vrot.slane %v500_v36, 1  ;;  %v206_v33 = vrot.slane %v500_v36, 2  ;;  %v219_v56 = vrot.slane %v500_v36, 3 }
  0x96   :  { %v117_v48 = vpop.permute.xlu1 %116 }
  0x98   :  { %v30_v18 = vpop.xlane.xlu0 %29 }
  0x9b   :  { %v131_v62 = vpop.permute.xlu1 %130 }
  0x9c   :  { %v141_v39 = vmul.f32 %v139_v29, %v131_v62 }
  0xa0   :  { %v38_v21 = vpop.permute.xlu0 %37  ;;  %v145_v15 = vpop.permute.xlu1 %144 }
  0xa1   :  { %v43_v22 = vrot.slane %v38_v21, %v23_v6  ;;  %v123_v6 = vsel %vm68_vm3, %v122_v61, %v121_v63  ;;  %v161_v21 = vrot.slane %v417_v27, 7  ;;  %v493_v27 = vld [vmem:[%s583_s3 + $0x28] sm:$0xff]  ;;  %v210_v61 = vrot.slane %v508_v41, 7 }
  0xa2   :  { %v125_v16 = vsel %vm71_vm4, %v124_v5, %v123_v6  ;;  %v182_v42 = vrot.slane %v493_v27, 6  ;;  %v195_v47 = vrot.slane %v493_v27, 7  ;;  %v222_v1 = vrot.slane %v493_v27, 1 }
  0xa3   :  { %v44_v23 = vmul.f32 %v312_v20, %v43_v22  ;;  %v162_v22 = vrot.slane %v422_v28, 6  ;;  %v127_v25 = vmul.f32 %v125_v16, %v117_v48  ;;  %v184_v48 = vrot.slane %v508_v41, 5 }
  0xa5   :  { %v45_v24 = vadd.f32 %v44_v23, %v30_v18  ;;  %v150_v18 = vrot.slane %v427_v30, 4  ;;  %v484_v23 = vld [vmem:[%s583_s3 + $0x18] sm:$0xff]  ;;  %v163_v34 = vsel %vm65_vm2, %v162_v22, %v161_v21  ;;  %v159_v35 = vpop.permute.xlu1 %158  ;;  %v234_v21 = vrot.slane %v500_v36, 4  ;;  %s374_s3 = smov 124  }
  0xa6   :  { %v165_v43 = vsel %vm68_vm3, %v164_v32, %v163_v34  ;;  %v207_v45 = vrot.slane %v484_v23, 1  ;;  %v194_v49 = vsel %vm65_vm2, %v484_v23, %v193_v38  ;;  %v220_v57 = vrot.slane %v484_v23, 2 }
  0xa7   :  { %173 = vperm.xlu1 %333, %v45_v24   ;;  %v167_v52 = vsel %vm71_vm4, %v166_v37, %v165_v43  ;;  %v196_v58 = vsel %vm68_vm3, %v195_v47, %v194_v49  ;;  %v235_v22 = vrot.slane %v484_v23, 3  ;;  %v251_v37 = vrot.slane %v484_v23, 4 }
  0xa8   :  { %v208_v55 = vsel %vm65_vm2, %v207_v45, %v206_v33  ;;  %v169_v63 = vmul.f32 %v167_v52, %v159_v35  ;;  %v198_v2 = vsel %vm71_vm4, %v197_v54, %v196_v58  ;;  %v221_v3 = vsel %vm65_vm2, %v220_v57, %v219_v56 }
  0xa9   :  { %v209_v0 = vsel %vm68_vm3, %v493_v27, %v208_v55  ;;  %v253_v38 = vrot.slane %v493_v27, 3  ;;  %v269_v47 = vrot.slane %v493_v27, 4  ;;  %v271_v49 = vrot.slane %v508_v41, 3 }
  0xaa   :  { %v211_v5 = vsel %vm71_vm4, %v210_v61, %v209_v0  ;;  %v282_v56 = vrot.slane %v500_v36, 7  ;;  %v283_v57 = vrot.slane %v484_v23, 6  ;;  %v285_v58 = vrot.slane %v493_v27, 5 }
  0xab   :  { %334 = vset.pattern.permute.xlu1 %v367_v9 }
  0xac   :  { %190 = vperm.xlu1 %334, %v45_v24  }
  0xb0   :  { %335 = vset.pattern.permute.xlu1 %v368_v12 }
  0xb1   :  { %203 = vperm.xlu1 %335, %v45_v24  }
  0xb5   :  { %336 = vset.pattern.permute.xlu1 %v369_v13 }
  0xb6   :  { %216 = vperm.xlu1 %336, %v45_v24   ;;  %v114_v24 = vadd.f32 %v113_v14, %v101_v11 }
  0xb8   :  { %v128_v30 = vadd.f32 %v127_v25, %v114_v24  ;;  %v237_v24 = vrot.slane %v493_v27, 2  ;;  %v236_v25 = vsel %vm65_vm2, %v235_v22, %v234_v21 }
  0xba   :  { %338 = vset.pattern.permute.xlu1 %v367_v9  ;;  %v148_v9 = vrot.slane %v422_v28, 5  ;;  %v180_v28 = vrot.slane %v484_v23, 7  ;;  %v142_v50 = vadd.f32 %v141_v39, %v128_v30  ;;  %v238_v29 = vsel %vm68_vm3, %v237_v24, %v236_v25 }
  0xbb   :  { %v255_v39 = vrot.slane %v508_v41, 2 }
  0xbc   :  { %v149_v20 = vsel %vm65_vm2, %v148_v9, %v147_v8  ;;  %v181_v44 = vsel %vm65_vm2, %v180_v28, %v500_v36  ;;  %v223_v9 = vsel %vm68_vm3, %v222_v1, %v221_v3 }
  0xbd   :  { %v151_v31 = vsel %vm68_vm3, %v150_v18, %v149_v20  ;;  %v183_v53 = vsel %vm68_vm3, %v182_v42, %v181_v44  ;;  %v224_v14 = vsel %vm71_vm4, %v508_v41, %v223_v9 }
  0xbe   :  { %v153_v40 = vsel %vm71_vm4, %v152_v26, %v151_v31  ;;  %v185_v59 = vsel %vm71_vm4, %v184_v48, %v183_v53  ;;  %v239_v26 = vrot.slane %v508_v41, 1 }
  0xbf   :  { %v155_v51 = vmul.f32 %v153_v40, %v145_v15 }
  0xc0   :  { %v240_v31 = vsel %vm71_vm4, %v239_v26, %v238_v29 }
  0xc1   :  { %v156_v62 = vadd.f32 %v155_v51, %v142_v50 }
  0xc3   :  { %v170_v6 = vadd.f32 %v169_v63, %v156_v62 }
 0x126   :  { %v174_v46 = vpop.permute.xlu1 %173 }
 0x127   :  { %v187_v4 = vmul.f32 %v185_v59, %v174_v46  ;;  %v267_v46 = vrot.slane %v484_v23, 5  ;;  %v284_v59 = vsel %vm65_vm2, %v283_v57, %v282_v56 }
 0x128   :  { %v286_v61 = vsel %vm68_vm3, %v285_v58, %v284_v59 }
 0x129   :  { %v188_v10 = vadd.f32 %v187_v4, %v170_v6 }
 0x12b   :  { %v191_v60 = vpop.permute.xlu1 %190 }
 0x12c   :  { %v200_v7 = vmul.f32 %v198_v2, %v191_v60  ;;  %v287_v60 = vrot.slane %v508_v41, 4 }
 0x12e   :  { %v201_v15 = vadd.f32 %v200_v7, %v188_v10  ;;  %v288_v62 = vsel %vm71_vm4, %v287_v60, %v286_v61 }
 0x130   :  { %v204_v8 = vpop.permute.xlu1 %203 }
 0x131   :  { %v213_v11 = vmul.f32 %v211_v5, %v204_v8 }
 0x133   :  { %v214_v17 = vadd.f32 %v213_v11, %v201_v15 }
 0x135   :  { %v217_v16 = vpop.permute.xlu1 %216 }
 0x136   :  { %v226_v18 = vmul.f32 %v224_v14, %v217_v16 }
 0x138   :  { %v227_v19 = vadd.f32 %v226_v18, %v214_v17 }
 0x13a   :  { %v228_v20 = vmax.f32 %v227_v19, 0.0 }
 0x13c   :  { %231 = vperm.xlu0 %337, %v228_v20  }
 0x140   :  { %340 = vset.pattern.permute.xlu0 %v369_v13  ;;  %v250_v13 = vrot.slane %v500_v36, 5 }
 0x142   :  { %v252_v30 = vsel %vm65_vm2, %v251_v37, %v250_v13 }
 0x143   :  { %v254_v40 = vsel %vm68_vm3, %v253_v38, %v252_v30 }
 0x144   :  { %v256_v42 = vsel %vm71_vm4, %v255_v39, %v254_v40 }
 0x1bb   :  { %v232_v32 = vpop.permute.xlu0 %231 }
 0x1bc   :  { %v242_v28 = vmul.f32 %v240_v31, %v232_v32 }
 0x1be   :  { %v243_v34 = vadd.f32 %v242_v28, %v227_v19 }
 0x1c0   :  { %v244_v35 = vmax.f32 %v243_v34, 0.0 }
 0x1c2   :  { %247 = vperm.xlu1 %338, %v244_v35  }
 0x1c6   :  { %339 = vset.pattern.permute.xlu1 %v368_v12  ;;  %v266_v12 = vrot.slane %v500_v36, 6 }
 0x1c8   :  { %v268_v48 = vsel %vm65_vm2, %v267_v46, %v266_v12 }
 0x1c9   :  { %v270_v50 = vsel %vm68_vm3, %v269_v47, %v268_v48 }
 0x1ca   :  { %v272_v51 = vsel %vm71_vm4, %v271_v49, %v270_v50 }
 0x241   :  { %v248_v43 = vpop.permute.xlu1 %247 }
 0x242   :  { %v258_v44 = vmul.f32 %v256_v42, %v248_v43 }
 0x244   :  { %v259_v33 = vadd.f32 %v258_v44, %v243_v34 }
 0x246   :  { %v260_v45 = vmax.f32 %v259_v33, 0.0 }
 0x248   :  { %263 = vperm.xlu1 %339, %v260_v45  }
 0x2c7   :  { %v264_v52 = vpop.permute.xlu1 %263 }
 0x2c8   :  { %v274_v53 = vmul.f32 %v272_v51, %v264_v52 }
 0x2ca   :  { %v275_v54 = vadd.f32 %v274_v53, %v259_v33 }
 0x2cc   :  { %v276_v55 = vmax.f32 %v275_v54, 0.0 }
 0x2ce   :  { %279 = vperm.xlu0 %340, %v276_v55  }
 0x34d   :  { %v280_v63 = vpop.permute.xlu0 %279 }
 0x34e   :  { %v290_v0 = vmul.f32 %v288_v62, %v280_v63 }
 0x350   :  { %v291_v1 = vadd.f32 %v290_v0, %v275_v54 }
 0x352   :  { %293 = vrot.lane.b32.xlu1 %v291_v1, %s374_s3 }
 0x3c4   :  { %v294_v23 = vpop.permute.xlu1 %293 }
 0x3c5   :  { %297 = vst.msk [vmem:[#allocation2] sm:$0xf] %vm296_vm5, %v294_v23 }
 0x3c6   :  { %352 = shalt.err (!%p349_p4)
}
 0x3c7   :  { %s353_s13 = scalar_lea.hbm %s584_s4, 64 }
 0x3c8   :  { %p354_p5 = scmp.ne.s32.totalorder %s584_s4, %s353_s13  ;;  %p357_p6 = scmp.lt.u32.totalorder %s353_s13, %s584_s4 }
 0x3ca   :  { %p359_p7 = pnand %p357_p6, %p354_p5 }
 0x3cc   :  { %362 = shalt.err (!%p359_p7)
}
 0x3cd   :  { %307 = dma.vmem_to_hbm [thread:$0]  %s305_s9, 64, %s584_s4, [#allocation3]  }
 0x3ce   :  { %363 = dma.done.wait [#allocation3], 64  }
 0x3cf   :  { %364 = vsyncadd [#allocation3], 4294967232 }
 0x3d0   :  { %311 = vsyncpa [#allocation3], 1 }

</bundles_post_ra>
